<compile_context>
chip_gen: v5e
topology: v5e:2x2
jax: 0.10.0
libtpu: 0.0.40
codegen_flags: <defaults>
</compile_context>

<pallas_src>
import numpy as np
import jax
import jax.numpy as jnp
from jax.experimental import pallas as pl
from jax.experimental.pallas import tpu as pltpu


def upsample_conv3x3_kernel(x_ref, rr_ref, rc_ref, b_ref, o_ref, u_ref):
    # x_ref : (1, H, C*W)          original-res input, lane = ci*W + iw
    # rr_ref: (1, TH+2, H)         row replication (+ top/bottom zero pad) for this row tile
    # rc_ref: (C*W, 9*C*Wo)        weight-folded column replication (+ left/right pad);
    #                              lane block (ky*3+kx) holds lane = co*Wo + wo
    # b_ref : (TH, C*Wo)           bias, pre-broadcast over rows and lanes
    # o_ref : (1, TH, C*Wo)        lane-dense output slab (lane = co*Wo + wo)
    # u_ref : (TH+2, 9*C*Wo) f32   VMEM scratch holding the weighted tap planes
    TH, CWo = o_ref.shape[1], o_ref.shape[2]

    # Fused nearest-x2 upsample + zero pad + weight application + C_in
    # contraction: two matmuls on the otherwise-idle MXU (f32 throughout).
    rows_up = jnp.dot(rr_ref[0], x_ref[0].astype(jnp.float32),
                      preferred_element_type=jnp.float32)            # (TH+2, C*W)
    u_ref[...] = jnp.dot(rows_up, rc_ref[...],
                         preferred_element_type=jnp.float32)         # (TH+2, 9*C*Wo)

    # 3x3 conv finish = bias + 9 lane-aligned, sublane-shifted adds (pure VPU;
    # the (ci, kx, co) work already happened inside the rc matmul above).
    acc = b_ref[...]
    for ky in range(3):
        for kx in range(3):
            blk = (ky * 3 + kx) * CWo
            acc = acc + u_ref[ky:ky + TH, blk:blk + CWo]

    # Single lane-dense store (no per-channel 32-lane masked stores).
    o_ref[0] = acc.astype(o_ref.dtype)


def upsample_forward(x, weight, bias, *, row_tile=None):
    """Nearest-x2 upsample + Conv2d(C, C, 3, padding=1).

    x: (N, C, H, W) NCHW; weight: (C, C, 3, 3) OIHW (torch layout); bias: (C,).
    Returns (N, C, 2H, 2W) NCHW.
    """
    N, C, H, W = x.shape
    assert weight.shape == (C, C, 3, 3) and bias.shape == (C,)
    Ho, Wo = 2 * H, 2 * W

    # Default: one row tile per image (grid = (N, 1)); shrink only if the
    # per-step scratch block would get large (relevant for big images / v7x).
    if row_tile is None:
        row_tile = Ho
        while (row_tile > 8 and row_tile % 2 == 0
               and (row_tile + 2) * 9 * C * Wo * 4 > (8 << 20)):
            row_tile //= 2
    row_tile = min(row_tile, Ho)
    n_tiles = Ho // row_tile
    assert Ho % row_tile == 0, "row_tile must divide 2*H"
    assert n_tiles == 1 or row_tile % 8 == 0, "row_tile must be a multiple of 8 when tiling"

    # Lane-packed original-resolution input: lane = ci*W + iw (4x smaller than
    # any upsampled intermediate; the only wrapper-side input relayout).
    x_p = jnp.transpose(x, (0, 2, 1, 3)).reshape(N, H, C * W)

    # Constant row-replication windows (one (row_tile+2, H) slab per row tile).
    # Rows 0 / Ho+1 of the padded upsampled image are all-zero => vertical pad
    # for free.  NOTE: the (row_tile+2) sublane dim is only legal because the
    # block equals the full array dim — do not re-tile rr along that axis.
    rr_full = np.zeros((Ho + 2, H), np.float32)
    rr_full[1 + np.arange(Ho), np.arange(Ho) // 2] = 1.0
    rr_tiles = np.stack([rr_full[t * row_tile: t * row_tile + row_tile + 2]
                         for t in range(n_tiles)])                    # (n_tiles, TH+2, H)

    # Column replication / horizontal-pad indicator per kx tap:
    #   R[iw, kx, wo] = 1 iff padded column (wo + kx) is not padding and maps
    #   back to original column iw under nearest-x2 upsampling.
    R = np.zeros((W, 3, Wo), np.float32)
    for kx in range(3):
        p = np.arange(Wo) + kx                       # padded column index
        valid = (p >= 1) & (p <= Wo)
        R[(p[valid] - 1) // 2, kx, np.arange(Wo)[valid]] = 1.0

    # Fold the conv weights + output-channel lane broadcast into the column
    # replication operand (exact per-product f32; one input col per output col):
    #   rc[ci*W+iw, (ky*3+kx)*C*Wo + co*Wo + wo] = weight[co,ci,ky,kx] * R[iw,kx,wo]
    w_f = weight.astype(jnp.float32)                                  # (co, ci, ky, kx)
    rc = jnp.einsum('oikl,wlv->iwklov', w_f, jnp.asarray(R))          # (ci,iw,ky,kx,co,wo)
    rc = rc.reshape(C * W, 9 * C * Wo)

    # Bias pre-broadcast to the accumulator layout (rows x lanes) host-side, so
    # the kernel needs no sublane broadcasts at all.
    b_lanes = jnp.broadcast_to(
        jnp.repeat(bias.astype(jnp.float32), Wo)[None, :], (row_tile, C * Wo))

    out_slab = pl.pallas_call(
        upsample_conv3x3_kernel,
        out_shape=jax.ShapeDtypeStruct((N, Ho, C * Wo), x.dtype),
        grid=(N, n_tiles),
        in_specs=[
            pl.BlockSpec((1, H, C * W), lambda n, t: (n, 0, 0)),          # input (const over t)
            pl.BlockSpec((1, row_tile + 2, H), lambda n, t: (t, 0, 0)),   # row replication tile
            pl.BlockSpec((C * W, 9 * C * Wo), lambda n, t: (0, 0)),       # weights x col repl. (resident)
            pl.BlockSpec((row_tile, C * Wo), lambda n, t: (0, 0)),        # bias (resident)
        ],
        out_specs=pl.BlockSpec((1, row_tile, C * Wo), lambda n, t: (n, t, 0)),
        scratch_shapes=[pltpu.VMEM((row_tile + 2, 9 * C * Wo), jnp.float32)],
        compiler_params=pltpu.CompilerParams(
            dimension_semantics=("parallel", "parallel"),
            vmem_limit_bytes=32 * 1024 * 1024),
    )(x_p, jnp.asarray(rr_tiles), rc, b_lanes)

    # Lane-dense store in-kernel + one cheap XLA reshape/transpose out here.
    return out_slab.reshape(N, Ho, C, Wo).transpose(0, 2, 1, 3)


if __name__ == "__main__":
    key = jax.random.PRNGKey(0)
    k_x, k_w, k_b = jax.random.split(key, 3)

    N, C, H, W = 2, 4, 16, 16
    x = jax.random.normal(k_x, (N, C, H, W), dtype=jnp.float32)
    weight = jax.random.normal(k_w, (C, C, 3, 3), dtype=jnp.float32) * 0.1
    bias = jax.random.normal(k_b, (C,), dtype=jnp.float32) * 0.1

    fn = jax.jit(upsample_forward)      # default row_tile = Ho -> grid (N, 1)
    out = jax.block_until_ready(fn(x, weight, bias))

    # Pure-JAX reference: nearest x2 upsample + conv2d (NCHW / OIHW), padding 1.
    x_up = jnp.repeat(jnp.repeat(x, 2, axis=2), 2, axis=3)
    ref = jax.lax.conv_general_dilated(
        x_up, weight, window_strides=(1, 1), padding="SAME",
        dimension_numbers=("NCHW", "OIHW", "NCHW"),
    ) + bias[None, :, None, None]

    assert out.shape == (N, C, 2 * H, 2 * W)
    assert jnp.allclose(out, ref, atol=1e-4, rtol=1e-4), "mismatch vs reference"
    print("KERNEL_OK")
</pallas_src>

<mosaic_0001>
module attributes {stable_mosaic.version = 11 : i64} {
  func.func @upsample_conv3x3_kernel(%arg0: i32, %arg1: i32, %arg2: memref<1x16x64xf32, #tpu.memory_space<vmem>>, %arg3: memref<1x34x16xf32, #tpu.memory_space<vmem>>, %arg4: memref<64x1152xf32, #tpu.memory_space<vmem>>, %arg5: memref<32x128xf32, #tpu.memory_space<vmem>>, %arg6: memref<1x32x128xf32, #tpu.memory_space<vmem>>, %arg7: memref<34x1152xf32, #tpu.memory_space<vmem>>) attributes {dimension_semantics = [#tpu.dimension_semantics<parallel>, #tpu.dimension_semantics<parallel>], iteration_bounds = array<i64: 2, 1>, scalar_prefetch = 0 : i64, scratch_operands = 1 : i64, tpu.core_type = #tpu.core_type<tc>, window_params = [{transform_indices = @transform_0, window_bounds = array<i64: 1, 16, 64>}, {transform_indices = @transform_1, window_bounds = array<i64: 1, 34, 16>}, {pipeline_mode = #tpu.pipeline_mode<synchronous>, transform_indices = @transform_2, window_bounds = array<i64: 64, 1152>}, {pipeline_mode = #tpu.pipeline_mode<synchronous>, transform_indices = @transform_3, window_bounds = array<i64: 32, 128>}, {transform_indices = @transform_4, window_bounds = array<i64: 1, 32, 128>}]} {
    %c0 = arith.constant 0 : index
    %c0_0 = arith.constant 0 : index
    %c0_1 = arith.constant 0 : index
    %0 = vector.load %arg3[%c0, %c0_0, %c0_1] : memref<1x34x16xf32, #tpu.memory_space<vmem>>, vector<1x34x16xf32>
    %1 = vector.shape_cast %0 : vector<1x34x16xf32> to vector<34x16xf32>
    %c0_2 = arith.constant 0 : index
    %c0_3 = arith.constant 0 : index
    %c0_4 = arith.constant 0 : index
    %2 = vector.load %arg2[%c0_2, %c0_3, %c0_4] : memref<1x16x64xf32, #tpu.memory_space<vmem>>, vector<1x16x64xf32>
    %3 = vector.shape_cast %2 : vector<1x16x64xf32> to vector<16x64xf32>
    %cst = arith.constant dense<0.000000e+00> : vector<34x64xf32>
    %4 = tpu.matmul %1, %3, %cst {dimension_numbers = #tpu.dot_dimension_numbers<[1], [0], [0], [1], [0, 0, 1, 1], [], []>} : vector<34x16xf32>, vector<16x64xf32>, vector<34x64xf32> -> vector<34x64xf32>
    %c0_5 = arith.constant 0 : index
    %c0_6 = arith.constant 0 : index
    %5 = vector.load %arg4[%c0_5, %c0_6] : memref<64x1152xf32, #tpu.memory_space<vmem>>, vector<64x1152xf32>
    %cst_7 = arith.constant dense<0.000000e+00> : vector<34x1152xf32>
    %6 = tpu.matmul %4, %5, %cst_7 {dimension_numbers = #tpu.dot_dimension_numbers<[1], [0], [0], [1], [0, 0, 1, 1], [], []>} : vector<34x64xf32>, vector<64x1152xf32>, vector<34x1152xf32> -> vector<34x1152xf32>
    %c0_8 = arith.constant 0 : index
    %c0_9 = arith.constant 0 : index
    %7 = vector.load %arg7[%c0_8, %c0_9] : memref<34x1152xf32, #tpu.memory_space<vmem>>, vector<34x1152xf32>
    tpu.vector_store %arg7[%c0_8, %c0_9], %6 {strides = array<i32>} : memref<34x1152xf32, #tpu.memory_space<vmem>>, vector<34x1152xf32>,
    %c0_10 = arith.constant 0 : index
    %c0_11 = arith.constant 0 : index
    %8 = vector.load %arg5[%c0_10, %c0_11] : memref<32x128xf32, #tpu.memory_space<vmem>>, vector<32x128xf32>
    %c0_12 = arith.constant 0 : index
    %c0_13 = arith.constant 0 : index
    %9 = vector.load %arg7[%c0_12, %c0_13] : memref<34x1152xf32, #tpu.memory_space<vmem>>, vector<32x128xf32>
    %10 = arith.addf %8, %9 : vector<32x128xf32>
    %c0_14 = arith.constant 0 : index
    %c128 = arith.constant 128 : index
    %11 = vector.load %arg7[%c0_14, %c128] : memref<34x1152xf32, #tpu.memory_space<vmem>>, vector<32x128xf32>
    %12 = arith.addf %10, %11 : vector<32x128xf32>
    %c0_15 = arith.constant 0 : index
    %c256 = arith.constant 256 : index
    %13 = vector.load %arg7[%c0_15, %c256] : memref<34x1152xf32, #tpu.memory_space<vmem>>, vector<32x128xf32>
    %14 = arith.addf %12, %13 : vector<32x128xf32>
    %c1 = arith.constant 1 : index
    %c384 = arith.constant 384 : index
    %15 = vector.load %arg7[%c1, %c384] : memref<34x1152xf32, #tpu.memory_space<vmem>>, vector<32x128xf32>
    %16 = arith.addf %14, %15 : vector<32x128xf32>
    %c1_16 = arith.constant 1 : index
    %c512 = arith.constant 512 : index
    %17 = vector.load %arg7[%c1_16, %c512] : memref<34x1152xf32, #tpu.memory_space<vmem>>, vector<32x128xf32>
    %18 = arith.addf %16, %17 : vector<32x128xf32>
    %c1_17 = arith.constant 1 : index
    %c640 = arith.constant 640 : index
    %19 = vector.load %arg7[%c1_17, %c640] : memref<34x1152xf32, #tpu.memory_space<vmem>>, vector<32x128xf32>
    %20 = arith.addf %18, %19 : vector<32x128xf32>
    %c2 = arith.constant 2 : index
    %c768 = arith.constant 768 : index
    %21 = vector.load %arg7[%c2, %c768] : memref<34x1152xf32, #tpu.memory_space<vmem>>, vector<32x128xf32>
    %22 = arith.addf %20, %21 : vector<32x128xf32>
    %c2_18 = arith.constant 2 : index
    %c896 = arith.constant 896 : index
    %23 = vector.load %arg7[%c2_18, %c896] : memref<34x1152xf32, #tpu.memory_space<vmem>>, vector<32x128xf32>
    %24 = arith.addf %22, %23 : vector<32x128xf32>
    %c2_19 = arith.constant 2 : index
    %c1024 = arith.constant 1024 : index
    %25 = vector.load %arg7[%c2_19, %c1024] : memref<34x1152xf32, #tpu.memory_space<vmem>>, vector<32x128xf32>
    %26 = arith.addf %24, %25 : vector<32x128xf32>
    %c0_20 = arith.constant 0 : index
    %c0_21 = arith.constant 0 : index
    %c0_22 = arith.constant 0 : index
    %27 = vector.load %arg6[%c0_20, %c0_21, %c0_22] : memref<1x32x128xf32, #tpu.memory_space<vmem>>, vector<1x32x128xf32>
    %28 = vector.shape_cast %27 : vector<1x32x128xf32> to vector<32x128xf32>
    %29 = vector.shape_cast %26 : vector<32x128xf32> to vector<1x32x128xf32>
    tpu.vector_store %arg6[%c0_20, %c0_21, %c0_22], %29 {strides = array<i32>} : memref<1x32x128xf32, #tpu.memory_space<vmem>>, vector<1x32x128xf32>,
    return
  }
  func.func @transform_0(%arg0: i32, %arg1: i32) -> (i32, i32, i32) {
    %c0_i32 = arith.constant 0 : i32
    %c0_i32_0 = arith.constant 0 : i32
    %c0_i32_1 = arith.constant 0 : i32
    return %arg0, %c0_i32, %c0_i32_0 : i32, i32, i32
  }
  func.func @transform_1(%arg0: i32, %arg1: i32) -> (i32, i32, i32) {
    %c0_i32 = arith.constant 0 : i32
    %c0_i32_0 = arith.constant 0 : i32
    %c0_i32_1 = arith.constant 0 : i32
    return %arg1, %c0_i32, %c0_i32_0 : i32, i32, i32
  }
  func.func @transform_2(%arg0: i32, %arg1: i32) -> (i32, i32) {
    %c0_i32 = arith.constant 0 : i32
    %c0_i32_0 = arith.constant 0 : i32
    %c0_i32_1 = arith.constant 0 : i32
    return %c0_i32, %c0_i32_0 : i32, i32
  }
  func.func @transform_3(%arg0: i32, %arg1: i32) -> (i32, i32) {
    %c0_i32 = arith.constant 0 : i32
    %c0_i32_0 = arith.constant 0 : i32
    %c0_i32_1 = arith.constant 0 : i32
    return %c0_i32, %c0_i32_0 : i32, i32
  }
  func.func @transform_4(%arg0: i32, %arg1: i32) -> (i32, i32, i32) {
    %c0_i32 = arith.constant 0 : i32
    %c0_i32_0 = arith.constant 0 : i32
    return %arg0, %arg1, %c0_i32 : i32, i32, i32
  }
}

</mosaic_0001>

<bundles_post_ra>
// kernel: upsample_forward.1
= control target key start
LH: loop header
LB: loop body
LE: loop exit
PB: predicated region body
PF: predicated region fallthrough
CT: control target
= control target key end

     0   :  { %s1164_s15 = smov 0   ;;  %s1166_s16 = smov 0   ;;  %s1622_s0 = inlined_call_operand.vmem [shape: f32[2,16,64], index: 0, kind: input, shape index: {}]   ;;  %s1623_s1 = inlined_call_operand.vmem [shape: f32[1,34,16], index: 1, kind: input, shape index: {}]   ;;  %s1624_s2 = inlined_call_operand.vmem [shape: f32[64,1152], index: 2, kind: input, shape index: {}]   ;;  %s1625_s3 = inlined_call_operand.vmem [shape: f32[32,128], index: 3, kind: input, shape index: {}]   ;;  %s1626_s4 = inlined_call_operand.vmem [shape: f32[2,32,128], index: 4, kind: output, shape index: {}]  }
   0x1   :  { %s1168_s17 = smov 0  }
   0x2 LB: > { %s26_s18 = sadd.s32 1, %s1133_s16  ;;  %p1014_p0 = scmp.ge.s32.totalorder %s1137_s17, 1  ;;  %s1137_s17 = sphi %s1168_s17, %s14_s17   ;;  %s1133_s16 = sphi %s1166_s16, %s1628_s16   ;;  %s1129_s15 = sphi %s1164_s15, %s1627_s15  }
   0x3   : > { %p28_p1 = scmp.ge.s32.totalorder %s26_s18, 2  ;;  %p186_p2 = scmp.lt.s32.totalorder %s1137_s17, 3 }
   0x5   : > { %s1630_s18 = smov (%p28_p1, %s26_s18), 0  ;;  %p187_p3 = pnand %p1014_p0, %p186_p2 }
   0x6   : > { %p221_p4 = scmp.lt.s32.totalorder (!%p187_p3), %s1129_s15, 1 }
   0x7   : > { %190 = sbr.rel (%p187_p3) target bundleno = 400 (0x190), region = 36 }
   0xc   : > { %v359_v0 = vld [vmem:[%s1624_s2 + $0x1f8] sm:$0xff]  ;;  %s1632_s15 = smov (!%p221_p4, %s1129_s15), 1  ;;  %v350_v1 = vld [vmem:[%s1624_s2 + $0x1b0] sm:$0xff]  ;;  %v341_v2 = vld [vmem:[%s1624_s2 + $0x168] sm:$0xff]  ;;  %vm248_vm0 = vcmask 130048   ;;  %vm368_vm1 = vcmask 523264  }
   0xd   : > { %1075 = vmatpush.msra.mxu1 %v359_v0  ;;  %1076 = vmatpush.msra.mxu2 %v359_v0  ;;  %s1071_s23 = sshll.u32 %s1632_s15, 4  ;;  %v241_v5 = vld [vmem:[%s1623_s1] sm:$0xff]  ;;  %v243_v6 = vld [vmem:[%s1623_s1 + $0x10] sm:$0xff]  ;;  %v361_v8 = vld [vmem:[%s1624_s2 + $0x208] sm:$0xff]  ;;  %vm755_vm2 = vcmask 1046528   ;;  %vm837_vm3 = vcmask 1045504  }
   0xe   : > { %s225_s26 = scalar_lea.vmem %s1622_s0, %s1071_s23  ;;  %v332_v7 = vld [vmem:[%s1624_s2 + $0x120] sm:$0xff]  ;;  %v323_v10 = vld [vmem:[%s1624_s2 + $0xd8] sm:$0xff]  ;;  %v314_v12 = vld [vmem:[%s1624_s2 + $0x90] sm:$0xff]  ;;  %s1072_s5 = sshll.u32 %s1632_s15, 5 }
   0xf   : > { %1077 = vmatpush.msra.mxu1 %v350_v1  ;;  %1078 = vmatpush.msra.mxu2 %v350_v1  ;;  %v247_v3 = vld [vmem:[%s225_s26 + $0x8] sm:$0xff]  ;;  %v246_v4 = vld [vmem:[%s225_s26] sm:$0xff]  ;;  %v343_v11 = vld [vmem:[%s1624_s2 + $0x178] sm:$0xff]  ;;  %s1580_s8 = scalar_lea.vmem %s1626_s4, %s1072_s5 }
  0x10   : > { %278 = vmatpush.msra.mxu0 %v247_v3  ;;  %1073 = vmatpush.msra.mxu3 %v247_v3  ;;  %v352_v9 = vld [vmem:[%s1624_s2 + $0x1c0] sm:$0xff]  ;;  %v334_v13 = vld [vmem:[%s1624_s2 + $0x130] sm:$0xff]  ;;  %v242_v14 = vld [vmem:[%s1623_s1 + $0x8] sm:$0xff] }
  0x11   : > { %1079 = vmatpush.msra.mxu1 %v341_v2  ;;  %1080 = vmatpush.msra.mxu2 %v341_v2  ;;  %v244_v15 = vld [vmem:[%s1623_s1 + $0x18] sm:$0xff]  ;;  %v305_v16 = vld [vmem:[%s1624_s2 + $0x48] sm:$0xff]  ;;  %v316_v18 = vld [vmem:[%s1624_s2 + $0xa0] sm:$0xff] }
  0x12   : > { %279 = vmatpush.msra.mxu0 %v246_v4  ;;  %1074 = vmatpush.msra.mxu3 %v246_v4  ;;  %v325_v17 = vld [vmem:[%s1624_s2 + $0xe8] sm:$0xff]  ;;  %v296_v19 = vld [vmem:[%s1624_s2] sm:$0xff]  ;;  %v307_v20 = vld [vmem:[%s1624_s2 + $0x58] sm:$0xff] }
  0x13   : > { %1081 = vmatpush.msra.mxu1 %v332_v7  ;;  %1082 = vmatpush.msra.mxu2 %v332_v7  ;;  %v245_v21 = vld [vmem:[%s1623_s1 + $0x20] sm:$0x3]  ;;  %v362_v22 = vld [vmem:[%s1624_s2 + $0x210] sm:$0xff]  ;;  %v353_v23 = vld [vmem:[%s1624_s2 + $0x1c8] sm:$0xff] }
  0x14   : > { %1019 = vmatmul.msk.f32.vlgmr.msra.gmra.mxu0 %vm248_vm0, %v241_v5  ;;  %1021 = vmatmul.msk.f32.vlgmr.msra.gmra.mxu3 %vm248_vm0, %v243_v6  ;;  %v344_v24 = vld [vmem:[%s1624_s2 + $0x180] sm:$0xff]  ;;  %v298_v25 = vld [vmem:[%s1624_s2 + $0x10] sm:$0xff]  ;;  %v335_v26 = vld [vmem:[%s1624_s2 + $0x138] sm:$0xff] }
  0x15   : > { %392 = vmatpush.msrb.mxu0 %v359_v0  ;;  %456 = vmatpush.msrb.mxu3 %v361_v8  ;;  %v326_v27 = vld [vmem:[%s1624_s2 + $0xf0] sm:$0xff]  ;;  %v317_v28 = vld [vmem:[%s1624_s2 + $0xa8] sm:$0xff]  ;;  %v308_v29 = vld [vmem:[%s1624_s2 + $0x60] sm:$0xff] }
  0x16   : > { %1083 = vmatpush.msra.mxu1 %v323_v10  ;;  %1084 = vmatpush.msra.mxu2 %v323_v10  ;;  %v299_v30 = vld [vmem:[%s1624_s2 + $0x18] sm:$0xff]  ;;  %v354_v32 = vld [vmem:[%s1624_s2 + $0x1d0] sm:$0xff]  ;;  %v345_v33 = vld [vmem:[%s1624_s2 + $0x188] sm:$0xff] }
  0x17   : > { %393 = vmatpush.msrb.mxu0 %v350_v1  ;;  %457 = vmatpush.msrb.mxu3 %v352_v9  ;;  %v363_v31 = vld [vmem:[%s1624_s2 + $0x218] sm:$0xff]  ;;  %v360_v34 = vld [vmem:[%s1624_s2 + $0x200] sm:$0xff]  ;;  %v342_v38 = vld [vmem:[%s1624_s2 + $0x170] sm:$0xff] }
  0x18   : > { %1085 = vmatpush.msra.mxu1 %v314_v12  ;;  %1086 = vmatpush.msra.mxu2 %v314_v12  ;;  %v336_v35 = vld [vmem:[%s1624_s2 + $0x140] sm:$0xff]  ;;  %v351_v36 = vld [vmem:[%s1624_s2 + $0x1b8] sm:$0xff]  ;;  %v318_v39 = vld [vmem:[%s1624_s2 + $0xb0] sm:$0xff] }
  0x19   : > { %394 = vmatpush.msrb.mxu0 %v341_v2  ;;  %458 = vmatpush.msrb.mxu3 %v343_v11  ;;  %v327_v37 = vld [vmem:[%s1624_s2 + $0xf8] sm:$0xff]  ;;  %v333_v40 = vld [vmem:[%s1624_s2 + $0x128] sm:$0xff]  ;;  %v324_v42 = vld [vmem:[%s1624_s2 + $0xe0] sm:$0xff] }
  0x1a   : > { %1087 = vmatpush.msra.mxu1 %v305_v16  ;;  %1088 = vmatpush.msra.mxu2 %v305_v16  ;;  %v309_v41 = vld [vmem:[%s1624_s2 + $0x68] sm:$0xff]  ;;  %v300_v43 = vld [vmem:[%s1624_s2 + $0x20] sm:$0xff]  ;;  %v315_v44 = vld [vmem:[%s1624_s2 + $0x98] sm:$0xff] }
  0x1b   : > { %395 = vmatpush.msrb.mxu0 %v332_v7  ;;  %459 = vmatpush.msrb.mxu3 %v334_v13  ;;  %v365_v45 = vld [vmem:[%s1624_s2 + $0x228] sm:$0xff]  ;;  %v306_v46 = vld [vmem:[%s1624_s2 + $0x50] sm:$0xff]  ;;  %v356_v47 = vld [vmem:[%s1624_s2 + $0x1e0] sm:$0xff] }
  0x1c   : > { %1020 = vmatmul.msk.f32.gmra.mxu0 %vm248_vm0, %v242_v14  ;;  %1022 = vmatmul.msk.f32.gmra.mxu3 %vm248_vm0, %v244_v15  ;;  %v297_v48 = vld [vmem:[%s1624_s2 + $0x8] sm:$0xff]  ;;  %v347_v49 = vld [vmem:[%s1624_s2 + $0x198] sm:$0xff]  ;;  %v338_v50 = vld [vmem:[%s1624_s2 + $0x150] sm:$0xff] }
  0x1d   : > { %396 = vmatpush.msrb.mxu0 %v323_v10  ;;  %460 = vmatpush.msrb.mxu3 %v325_v17  ;;  %v329_v52 = vld [vmem:[%s1624_s2 + $0x108] sm:$0xff]  ;;  %v366_v53 = vld [vmem:[%s1624_s2 + $0x230] sm:$0xff]  ;;  %v320_v54 = vld [vmem:[%s1624_s2 + $0xc0] sm:$0xff] }
  0x1e   : > { %1089 = vmatpush.msra.mxu1 %v296_v19  ;;  %1090 = vmatpush.msra.mxu2 %v296_v19  ;;  %v357_v55 = vld [vmem:[%s1624_s2 + $0x1e8] sm:$0xff]  ;;  %v348_v56 = vld [vmem:[%s1624_s2 + $0x1a0] sm:$0xff]  ;;  %v311_v57 = vld [vmem:[%s1624_s2 + $0x78] sm:$0xff] }
  0x1f   : > { %397 = vmatpush.msrb.mxu0 %v314_v12  ;;  %461 = vmatpush.msrb.mxu3 %v316_v18  ;;  %v302_v59 = vld [vmem:[%s1624_s2 + $0x30] sm:$0xff]  ;;  %v339_v61 = vld [vmem:[%s1624_s2 + $0x158] sm:$0xff]  ;;  %v321_v0 = vld [vmem:[%s1624_s2 + $0xc8] sm:$0xff] }
  0x20   : > { %520 = vmatpush.msrb.mxu1 %v363_v31  ;;  %424 = vmatpush.msrb.mxu2 %v360_v34  ;;  %v330_v62 = vld [vmem:[%s1624_s2 + $0x110] sm:$0xff]  ;;  %v367_v63 = vld [vmem:[%s1624_s2 + $0x238] sm:$0xff]  ;;  %v364_v1 = vld [vmem:[%s1624_s2 + $0x220] sm:$0xff] }
  0x21   : > { %398 = vmatpush.msrb.mxu0 %v305_v16  ;;  %462 = vmatpush.msrb.mxu3 %v307_v20  ;;  %v355_v3 = vld [vmem:[%s1624_s2 + $0x1d8] sm:$0xff]  ;;  %v358_v4 = vld [vmem:[%s1624_s2 + $0x1f0] sm:$0xff]  ;;  %v312_v5 = vld [vmem:[%s1624_s2 + $0x80] sm:$0xff] }
  0x22   : > { %521 = vmatpush.msrb.mxu1 %v354_v32  ;;  %425 = vmatpush.msrb.mxu2 %v351_v36  ;;  %v346_v6 = vld [vmem:[%s1624_s2 + $0x190] sm:$0xff]  ;;  %v303_v7 = vld [vmem:[%s1624_s2 + $0x38] sm:$0xff]  ;;  %v349_v8 = vld [vmem:[%s1624_s2 + $0x1a8] sm:$0xff] }
  0x23   : > { %399 = vmatpush.msrb.mxu0 %v296_v19  ;;  %463 = vmatpush.msrb.mxu3 %v298_v25  ;;  %v337_v9 = vld [vmem:[%s1624_s2 + $0x148] sm:$0xff]  ;;  %v328_v10 = vld [vmem:[%s1624_s2 + $0x100] sm:$0xff]  ;;  %v319_v12 = vld [vmem:[%s1624_s2 + $0xb8] sm:$0xff] }
  0x24   : > { %1023 = vmatmul.msk.f32.gmra.mxu3 %vm248_vm0, %v245_v21  ;;  %522 = vmatpush.msrb.mxu1 %v345_v33  ;;  %v340_v13 = vld [vmem:[%s1624_s2 + $0x160] sm:$0xff]  ;;  %v331_v14 = vld [vmem:[%s1624_s2 + $0x118] sm:$0xff]  ;;  %v322_v15 = vld [vmem:[%s1624_s2 + $0xd0] sm:$0xff] }
  0x25   : > { %488 = vmatpush.msra.mxu0 %v362_v22  ;;  %426 = vmatpush.msrb.mxu2 %v342_v38  ;;  %v310_v16 = vld [vmem:[%s1624_s2 + $0x70] sm:$0xff]  ;;  %v313_v17 = vld [vmem:[%s1624_s2 + $0x88] sm:$0xff]  ;;  %v304_v18 = vld [vmem:[%s1624_s2 + $0x40] sm:$0xff] }
  0x26   : > { %523 = vmatpush.msrb.mxu1 %v336_v35  ;;  %584 = vmatpush.msra.mxu3 %v365_v45  ;;  %v301_v19 = vld [vmem:[%s1624_s2 + $0x28] sm:$0xff]  ;;  %v717_v33 = vld [vmem:[%s1625_s3] sm:$0xff] }
  0x27   : > { %489 = vmatpush.msra.mxu0 %v353_v23  ;;  %427 = vmatpush.msrb.mxu2 %v333_v40 }
  0x28   : > { %524 = vmatpush.msrb.mxu1 %v327_v37  ;;  %585 = vmatpush.msra.mxu3 %v356_v47 }
  0x29   : > { %490 = vmatpush.msra.mxu0 %v344_v24  ;;  %428 = vmatpush.msrb.mxu2 %v324_v42 }
  0x2a   : > { %525 = vmatpush.msrb.mxu1 %v318_v39  ;;  %586 = vmatpush.msra.mxu3 %v347_v49  ;;  %v719_v49 = vld [vmem:[%s1625_s3 + $0x10] sm:$0xff] }
  0x2b   : > { %491 = vmatpush.msra.mxu0 %v335_v26  ;;  %429 = vmatpush.msrb.mxu2 %v315_v44 }
  0x2c   : > { %526 = vmatpush.msrb.mxu1 %v309_v41  ;;  %587 = vmatpush.msra.mxu3 %v338_v50  ;;  %v718_v41 = vld [vmem:[%s1625_s3 + $0x8] sm:$0xff] }
  0x2d   : > { %492 = vmatpush.msra.mxu0 %v326_v27  ;;  %430 = vmatpush.msrb.mxu2 %v306_v46 }
  0x2e   : > { %527 = vmatpush.msrb.mxu1 %v300_v43  ;;  %588 = vmatpush.msra.mxu3 %v329_v52 }
  0x2f   : > { %493 = vmatpush.msra.mxu0 %v317_v28  ;;  %431 = vmatpush.msrb.mxu2 %v297_v48 }
  0x30   : > { %589 = vmatpush.msra.mxu3 %v320_v54 }
  0x31   : > { %494 = vmatpush.msra.mxu0 %v308_v29 }
  0x32   : > { %590 = vmatpush.msra.mxu3 %v311_v57  ;;  %v720_v57 = vld [vmem:[%s1625_s3 + $0x18] sm:$0xff] }
  0x33   : > { %495 = vmatpush.msra.mxu0 %v299_v30 }
  0x34   : > { %591 = vmatpush.msra.mxu3 %v302_v59 }
  0x91   : > { %v1340_v51 = vpop.f32.mrf.mxu0 }
  0x92   : > { %1024 = vmatmul.msk.f32.vlgmr.msrb.gmra.mxu0 %vm368_vm1, %v1340_v51  ;;  %1034 = vmatmul.msk.f32.vlgmr.msrb.gmra.mxu3 %vm368_vm1, %v1340_v51 }
  0x93   : > { %616 = vmatpush.msrb.mxu0 %v366_v53 }
  0x95   : > { %617 = vmatpush.msrb.mxu0 %v357_v55 }
  0x97   : > { %v1364_v58 = vpop.f32.mrf.mxu3  ;;  %618 = vmatpush.msrb.mxu0 %v348_v56 }
  0x99   : > { %v1369_v60 = vpop.f32.mrf.mxu0  ;;  %619 = vmatpush.msrb.mxu0 %v339_v61 }
  0x9a   : > { %1025 = vmatmul.msk.f32.vlgmr.msra.gmra.mxu1 %vm368_vm1, %v1369_v60  ;;  %1035 = vmatmul.msk.f32.gmra.mxu3 %vm368_vm1, %v1369_v60 }
  0x9b   : > { %1039 = vmatmul.msk.f32.vlgmr.msra.gmra.mxu0 %vm368_vm1, %v1340_v51  ;;  %648 = vmatpush.msra.mxu1 %v367_v63 }
  0x9c   : > { %620 = vmatpush.msrb.mxu0 %v330_v62 }
  0x9d   : > { %649 = vmatpush.msra.mxu1 %v358_v4 }
  0x9e   : > { %621 = vmatpush.msrb.mxu0 %v321_v0 }
  0x9f   : > { %v1392_v2 = vpop.f32.mrf.mxu3  ;;  %650 = vmatpush.msra.mxu1 %v349_v8 }
  0xa0   : > { %1027 = vmatmul.msk.f32.vlgmr.msra.gmra.mxu2 %vm368_vm1, %v1392_v2  ;;  %622 = vmatpush.msrb.mxu0 %v312_v5 }
  0xa1   : > { %552 = vmatpush.msra.mxu2 %v364_v1  ;;  %651 = vmatpush.msra.mxu1 %v340_v13 }
  0xa2   : > { %1026 = vmatmul.msk.f32.gmra.mxu1 %vm368_vm1, %v1364_v58  ;;  %1036 = vmatmul.msk.f32.gmra.mxu3 %vm368_vm1, %v1364_v58 }
  0xa3   : > { %1040 = vmatmul.msk.f32.gmra.mxu0 %vm368_vm1, %v1369_v60  ;;  %553 = vmatpush.msra.mxu2 %v355_v3 }
  0xa4   : > { %623 = vmatpush.msrb.mxu0 %v303_v7  ;;  %652 = vmatpush.msra.mxu1 %v331_v14 }
  0xa5   : > { %554 = vmatpush.msra.mxu2 %v346_v6 }
  0xa6   : > { %653 = vmatpush.msra.mxu1 %v322_v15 }
  0xa7   : > { %v293_v11 = vpop.f32.mrf.mxu3  ;;  %555 = vmatpush.msra.mxu2 %v337_v9 }
  0xa8   : > { %1028 = vmatmul.msk.f32.gmra.mxu2 %vm368_vm1, %v293_v11  ;;  %654 = vmatpush.msra.mxu1 %v313_v17 }
  0xa9   : > { %556 = vmatpush.msra.mxu2 %v328_v10 }
  0xaa   : > { %1037 = vmatmul.msk.f32.gmra.mxu3 %vm368_vm1, %v1392_v2  ;;  %1044 = vmatmul.msk.f32.vlgmr.msrb.gmra.mxu1 %vm368_vm1, %v1340_v51 }
  0xab   : > { %1041 = vmatmul.msk.f32.gmra.mxu0 %vm368_vm1, %v1364_v58  ;;  %557 = vmatpush.msra.mxu2 %v319_v12 }
  0xac   : > { %655 = vmatpush.msra.mxu1 %v304_v18 }
  0xad   : > { %558 = vmatpush.msra.mxu2 %v310_v16 }
  0xaf   : > { %559 = vmatpush.msra.mxu2 %v301_v19 }
  0xb0   : > { %1029 = vmatmul.msk.f32.vlgmr.msrb.gmra.mxu2 %vm368_vm1, %v1340_v51 }
  0xb2   : > { %1038 = vmatmul.msk.f32.gmra.mxu3 %vm368_vm1, %v293_v11  ;;  %1045 = vmatmul.msk.f32.gmra.mxu1 %vm368_vm1, %v1369_v60 }
  0xb3   : > { %1042 = vmatmul.msk.f32.gmra.mxu0 %vm368_vm1, %v1392_v2 }
  0xb8   : > { %1030 = vmatmul.msk.f32.gmra.mxu2 %vm368_vm1, %v1369_v60 }
  0xba   : > { %1046 = vmatmul.msk.f32.gmra.mxu1 %vm368_vm1, %v1364_v58  ;;  %1054 = vmatmul.msk.f32.vlgmr.msra.gmra.mxu3 %vm368_vm1, %v1340_v51 }
  0xbb   : > { %1043 = vmatmul.msk.f32.gmra.mxu0 %vm368_vm1, %v293_v11 }
  0xc0   : > { %1031 = vmatmul.msk.f32.gmra.mxu2 %vm368_vm1, %v1364_v58 }
  0xc2   : > { %1047 = vmatmul.msk.f32.gmra.mxu1 %vm368_vm1, %v1392_v2  ;;  %1055 = vmatmul.msk.f32.gmra.mxu3 %vm368_vm1, %v1369_v60 }
  0xc3   : > { %1059 = vmatmul.msk.f32.vlgmr.msrb.gmra.mxu0 %vm368_vm1, %v1340_v51 }
  0xc8   : > { %1032 = vmatmul.msk.f32.gmra.mxu2 %vm368_vm1, %v1392_v2 }
  0xca   : > { %1048 = vmatmul.msk.f32.gmra.mxu1 %vm368_vm1, %v293_v11  ;;  %1056 = vmatmul.msk.f32.gmra.mxu3 %vm368_vm1, %v1364_v58 }
  0xcb   : > { %1060 = vmatmul.msk.f32.gmra.mxu0 %vm368_vm1, %v1369_v60 }
  0xd0   : > { %1033 = vmatmul.msk.f32.gmra.mxu2 %vm368_vm1, %v293_v11 }
  0xd2   : > { %1057 = vmatmul.msk.f32.gmra.mxu3 %vm368_vm1, %v1392_v2  ;;  %1064 = vmatmul.msk.f32.vlgmr.msra.gmra.mxu1 %vm368_vm1, %v1340_v51 }
  0xd3   : > { %1061 = vmatmul.msk.f32.gmra.mxu0 %vm368_vm1, %v1364_v58 }
  0xd8   : > { %1049 = vmatmul.msk.f32.vlgmr.msra.gmra.mxu2 %vm368_vm1, %v1340_v51 }
  0xda   : > { %1058 = vmatmul.msk.f32.gmra.mxu3 %vm368_vm1, %v293_v11  ;;  %1065 = vmatmul.msk.f32.gmra.mxu1 %vm368_vm1, %v1369_v60 }
  0xdb   : > { %1062 = vmatmul.msk.f32.gmra.mxu0 %vm368_vm1, %v1392_v2 }
  0xe0   : > { %1050 = vmatmul.msk.f32.gmra.mxu2 %vm368_vm1, %v1369_v60 }
  0xe2   : > { %1066 = vmatmul.msk.f32.gmra.mxu1 %vm368_vm1, %v1364_v58 }
  0xe3   : > { %1063 = vmatmul.msk.f32.gmra.mxu0 %vm368_vm1, %v293_v11 }
  0xe8   : > { %1051 = vmatmul.msk.f32.gmra.mxu2 %vm368_vm1, %v1364_v58 }
  0xea   : > { %1067 = vmatmul.msk.f32.gmra.mxu1 %vm368_vm1, %v1392_v2 }
  0xf0   : > { %1052 = vmatmul.msk.f32.gmra.mxu2 %vm368_vm1, %v1392_v2 }
  0xf2   : > { %1068 = vmatmul.msk.f32.gmra.mxu1 %vm368_vm1, %v293_v11 }
  0xf8   : > { %1053 = vmatmul.msk.f32.gmra.mxu2 %vm368_vm1, %v293_v11 }
 0x10f   : > { %v401_v20 = vpop.f32.mrf.mxu0 }
 0x110   : > { %v725_v36 = vadd.f32 %v717_v33, %v401_v20 }
 0x115   : > { %v465_v21 = vpop.f32.mrf.mxu3 }
 0x117   : > { %v404_v22 = vpop.f32.mrf.mxu1 }
 0x118   : > { %v497_v23 = vpop.f32.mrf.mxu0  ;;  %v726_v44 = vadd.f32 %v718_v41, %v404_v22 }
 0x119   : > { %675 = vst [vmem:[#allocation2 + $0x48] sm:$0xff] %v497_v23 }
 0x11d   : > { %v468_v24 = vpop.f32.mrf.mxu3 }
 0x11f   : > { %v407_v25 = vpop.f32.mrf.mxu1 }
 0x120   : > { %v1513_v26 = vpop.f32.mrf.mxu0  ;;  %v727_v52 = vadd.f32 %v719_v49, %v407_v25  ;;  %v745_v7 = vld [vmem:[#allocation2 + $0x48] sm:$0xfe] }
 0x121   : > { %v756_v9 = vrot.slane %v745_v7, 1  ;;  %v757_v12 = vrot.slane %v1513_v26, 1 }
 0x123   : > { %v410_v27 = vpop.f32.mrf.mxu2  ;;  %v758_v16 = vsel %vm755_vm2, %v756_v9, %v757_v12 }
 0x124   : > { %v728_v60 = vadd.f32 %v720_v57, %v410_v27 }
 0x125   : > { %v471_v28 = vpop.f32.mrf.mxu3 }
 0x127   : > { %v529_v29 = vpop.f32.mrf.mxu1 }
 0x128   : > { %v1515_v30 = vpop.f32.mrf.mxu0  ;;  %676 = vst [vmem:[#allocation2 + $0x160] sm:$0xff] %v529_v29 }
 0x129   : > { %v759_v20 = vrot.slane %v1515_v30, 1 }
 0x12b   : > { %v413_v31 = vpop.f32.mrf.mxu2  ;;  %v760_v30 = vsel %vm755_vm2, %v757_v12, %v759_v20 }
 0x12d   : > { %v474_v32 = vpop.f32.mrf.mxu3 }
 0x12f   : > { %v1520_v34 = vpop.f32.mrf.mxu1  ;;  %v773_v10 = vld [vmem:[#allocation2 + $0x160] sm:$0xfe] }
 0x130   : > { %v1522_v35 = vpop.f32.mrf.mxu0  ;;  %v783_v13 = vrot.slane %v773_v10, 1  ;;  %v784_v14 = vrot.slane %v1520_v34, 1 }
 0x133   : > { %v433_v37 = vpop.f32.mrf.mxu2 }
 0x134   : > { %v733_v38 = vadd.f32 %v725_v36, %v433_v37 }
 0x135   : > { %v477_v39 = vpop.f32.mrf.mxu3 }
 0x136   : > { %v741_v40 = vadd.f32 %v733_v38, %v465_v21  ;;  %v785_v21 = vsel %vm755_vm2, %v783_v13, %v784_v14 }
 0x137   : > { %v1527_v42 = vpop.f32.mrf.mxu1 }
 0x138   : > { %v509_v43 = vpop.f32.mrf.mxu0  ;;  %v769_v18 = vadd.f32 %v758_v16, %v741_v40  ;;  %v786_v38 = vrot.slane %v1527_v42, 1 }
 0x139   : > { %711 = vst [vmem:[#allocation2 + $0x30] sm:$0x3] %v509_v43 }
 0x13a   : > { %v796_v29 = vadd.f32 %v785_v21, %v769_v18  ;;  %v787_v42 = vsel %vm755_vm2, %v784_v14, %v786_v38 }
 0x13b   : > { %v436_v45 = vpop.f32.mrf.mxu2 }
 0x13c   : > { %v734_v46 = vadd.f32 %v726_v44, %v436_v45 }
 0x13d   : > { %v593_v47 = vpop.f32.mrf.mxu3 }
 0x13e   : > { %v1529_v48 = vadd.f32 %v734_v46, %v468_v24  ;;  %678 = vst [vmem:[#allocation2 + $0x40] sm:$0xff] %v593_v47  ;;  %v761_v46 = vrot.slane %v1522_v35, 1 }
 0x13f   : > { %v1534_v50 = vpop.f32.mrf.mxu1 }
 0x140   : > { %v625_v51 = vpop.f32.mrf.mxu0  ;;  %v770_v43 = vadd.f32 %v760_v30, %v1529_v48  ;;  %v749_v16 = vld [vmem:[#allocation2 + $0x30] sm:$0x1] }
 0x141   : > { %679 = vst [vmem:[#allocation2 + $0x100] sm:$0xff] %v625_v51  ;;  %v763_v21 = vrot.slane %v749_v16, 1 }
 0x143   : > { %v439_v53 = vpop.f32.mrf.mxu2 }
 0x144   : > { %v735_v54 = vadd.f32 %v727_v52, %v439_v53  ;;  %v797_v53 = vadd.f32 %v787_v42, %v770_v43 }
 0x145   : > { %v1536_v55 = vpop.f32.mrf.mxu3  ;;  %v827_v19 = vld [vmem:[#allocation2 + $0x40] sm:$0xfc] }
 0x146   : > { %v1538_v56 = vadd.f32 %v735_v54, %v471_v28  ;;  %v838_v25 = vrot.slane %v827_v19, 2  ;;  %v839_v26 = vrot.slane %v1536_v55, 2 }
 0x147   : > { %v541_v58 = vpop.f32.mrf.mxu1 }
 0x148   : > { %712 = vst [vmem:[#allocation2 + $0x18] sm:$0x3] %v541_v58  ;;  %v1543_v59 = vpop.f32.mrf.mxu0  ;;  %v855_v22 = vld [vmem:[#allocation2 + $0x100] sm:$0xfc]  ;;  %v840_v39 = vsel %vm837_vm3, %v838_v25, %v839_v26 }
 0x149   : > { %v866_v33 = vrot.slane %v1543_v59, 2  ;;  %v762_v59 = vsel %vm755_vm2, %v759_v20, %v761_v46 }
 0x14b   : > { %v442_v61 = vpop.f32.mrf.mxu2 }
 0x14c   : > { %v736_v62 = vadd.f32 %v728_v60, %v442_v61  ;;  %v788_v60 = vrot.slane %v1534_v50, 1 }
 0x14d   : > { %v1545_v63 = vpop.f32.mrf.mxu3 }
 0x14e   : > { %v1547_v0 = vadd.f32 %v736_v62, %v474_v32  ;;  %v865_v32 = vrot.slane %v855_v22, 2  ;;  %v841_v51 = vrot.slane %v1545_v63, 2  ;;  %v771_v63 = vadd.f32 %v762_v59, %v1538_v56 }
 0x14f   : > { %v657_v1 = vpop.f32.mrf.mxu1  ;;  %v789_v7 = vsel %vm755_vm2, %v786_v38, %v788_v60  ;;  %v777_v18 = vld [vmem:[#allocation2 + $0x18] sm:$0x1] }
 0x150   : > { %v1549_v2 = vpop.f32.mrf.mxu0  ;;  %680 = vst [vmem:[#allocation2 + $0x108] sm:$0xff] %v657_v1  ;;  %v867_v45 = vsel %vm837_vm3, %v865_v32, %v866_v33  ;;  %v842_v61 = vsel %vm837_vm3, %v839_v26, %v841_v51  ;;  %v798_v10 = vadd.f32 %v789_v7, %v771_v63 }
 0x151   : > { %v868_v55 = vrot.slane %v1549_v2, 2 }
 0x153   : > { %v445_v3 = vpop.f32.mrf.mxu2  ;;  %v869_v2 = vsel %vm837_vm3, %v866_v33, %v868_v55 }
 0x155   : > { %v1551_v4 = vpop.f32.mrf.mxu3 }
 0x157   : > { %v1553_v5 = vpop.f32.mrf.mxu1  ;;  %v882_v31 = vld [vmem:[#allocation2 + $0x108] sm:$0xfc] }
 0x158   : > { %v1555_v6 = vpop.f32.mrf.mxu0  ;;  %v892_v40 = vrot.slane %v882_v31, 2  ;;  %v893_v41 = vrot.slane %v1553_v5, 2 }
 0x159   : > { %v870_v12 = vrot.slane %v1555_v6, 2 }
 0x15a   : > { %v894_v52 = vsel %vm837_vm3, %v892_v40, %v893_v41 }
 0x15b   : > { %v561_v8 = vpop.f32.mrf.mxu2 }
 0x15c   : > { %677 = vst [vmem:[#allocation2 + $0x128] sm:$0xff] %v561_v8  ;;  %v843_v8 = vrot.slane %v1551_v4, 2  ;;  %v871_v4 = vsel %vm837_vm3, %v868_v55, %v870_v12 }
 0x15d   : > { %v605_v11 = vpop.f32.mrf.mxu3 }
 0x15e   : > { %714 = vst [vmem:[#allocation2 + $0x148] sm:$0x3] %v605_v11  ;;  %v844_v14 = vsel %vm837_vm3, %v841_v51, %v843_v8 }
 0x15f   : > { %v1559_v15 = vpop.f32.mrf.mxu1 }
 0x160   : > { %v637_v17 = vpop.f32.mrf.mxu0  ;;  %v895_v62 = vrot.slane %v1559_v15, 2 }
 0x161   : > { %715 = vst [vmem:[#allocation2 + $0xc8] sm:$0x3] %v637_v17 }
 0x162   : > { %v896_v9 = vsel %vm837_vm3, %v893_v41, %v895_v62 }
 0x163   : > { %v800_v23 = vld [vmem:[#allocation2 + $0x128] sm:$0xfe]  ;;  %v564_v24 = vpop.f32.mrf.mxu2 }
 0x164   : > { %v810_v27 = vrot.slane %v800_v23, 1  ;;  %v811_v28 = vrot.slane %v564_v24, 1  ;;  %v790_v23 = vrot.slane %v777_v18, 1  ;;  %v764_v24 = vsel %vm755_vm2, %v761_v46, %v763_v21 }
 0x165   : > { %v772_v25 = vadd.f32 %v764_v24, %v1547_v0  ;;  %v831_v26 = vld [vmem:[#allocation2 + $0x148] sm:$0x3] }
 0x166   : > { %v812_v34 = vsel %vm755_vm2, %v810_v27, %v811_v28  ;;  %v791_v27 = vsel %vm755_vm2, %v788_v60, %v790_v23  ;;  %v845_v31 = vrot.slane %v831_v26, 2 }
 0x167   : > { %v823_v36 = vadd.f32 %v812_v34, %v796_v29  ;;  %v1568_v37 = vpop.f32.mrf.mxu1  ;;  %v799_v34 = vadd.f32 %v791_v27, %v772_v25 }
 0x168   : > { %v897_v15 = vrot.slane %v1568_v37, 2  ;;  %v846_v38 = vsel %vm837_vm3, %v843_v8, %v845_v31 }
 0x169   : > { %v851_v44 = vadd.f32 %v840_v39, %v823_v36 }
 0x16a   : > { %v898_v22 = vsel %vm837_vm3, %v895_v62, %v897_v15 }
 0x16b   : > { %v878_v47 = vadd.f32 %v867_v45, %v851_v44  ;;  %v567_v49 = vpop.f32.mrf.mxu2 }
 0x16c   : > { %v813_v48 = vrot.slane %v567_v49, 1 }
 0x16d   : > { %v905_v54 = vadd.f32 %v894_v52, %v878_v47 }
 0x16e   : > { %v814_v35 = vsel %vm755_vm2, %v811_v28, %v813_v48  ;;  %v859_v28 = vld [vmem:[#allocation2 + $0xc8] sm:$0x3] }
 0x16f   : > { %909 = vst [vmem:[%s1580_s8] sm:$0xff] %v905_v54  ;;  %v824_v57 = vadd.f32 %v814_v35, %v797_v53  ;;  %v669_v58 = vpop.f32.mrf.mxu1  ;;  %v872_v30 = vrot.slane %v859_v28, 2 }
 0x170   : > { %716 = vst [vmem:[#allocation2 + $0x38] sm:$0x3] %v669_v58 }
 0x171   : > { %v852_v1 = vadd.f32 %v842_v61, %v824_v57  ;;  %v873_v0 = vsel %vm837_vm3, %v870_v12, %v872_v30 }
 0x173   : > { %v879_v3 = vadd.f32 %v869_v2, %v852_v1  ;;  %v570_v5 = vpop.f32.mrf.mxu2 }
 0x174   : > { %v815_v50 = vrot.slane %v570_v5, 1 }
 0x175   : > { %v906_v11 = vadd.f32 %v896_v9, %v879_v3 }
 0x176   : > { %v816_v13 = vsel %vm755_vm2, %v813_v48, %v815_v50 }
 0x177   : > { %910 = vst [vmem:[%s1580_s8 + $0x8] sm:$0xff] %v906_v11  ;;  %v825_v56 = vadd.f32 %v816_v13, %v798_v10  ;;  %v886_v33 = vld [vmem:[#allocation2 + $0x38] sm:$0x3] }
 0x178   : > { %v899_v39 = vrot.slane %v886_v33, 2 }
 0x179   : > { %v853_v17 = vadd.f32 %v844_v14, %v825_v56 }
 0x17a   : > { %v900_v43 = vsel %vm837_vm3, %v897_v15, %v899_v39 }
 0x17b   : > { %v880_v19 = vadd.f32 %v871_v4, %v853_v17  ;;  %v573_v20 = vpop.f32.mrf.mxu2 }
 0x17c   : > { %713 = vst [vmem:[#allocation2 + $0x70] sm:$0x3] %v573_v20 }
 0x17d   : > { %v907_v6 = vadd.f32 %v898_v22, %v880_v19 }
 0x17f   : > { %911 = vst [vmem:[%s1580_s8 + $0x10] sm:$0xff] %v907_v6 }
 0x183   : > { %v804_v29 = vld [vmem:[#allocation2 + $0x70] sm:$0x1] }
 0x184   : > { %v817_v32 = vrot.slane %v804_v29, 1 }
 0x186   : > { %v818_v36 = vsel %vm755_vm2, %v815_v50, %v817_v32 }
 0x187   : > { %v826_v37 = vadd.f32 %v818_v36, %v799_v34 }
 0x189   : > { %v854_v40 = vadd.f32 %v846_v38, %v826_v37 }
 0x18b   : > { %v881_v41 = vadd.f32 %v873_v0, %v854_v40 }
 0x18d   : > { %v908_v44 = vadd.f32 %v900_v43, %v881_v41 }
 0x18f   : > { %912 = vst [vmem:[%s1580_s8 + $0x18] sm:$0xff] %v908_v44 }
 0x190 PF: > { %s14_s17 = sadd.s32 1, %s1137_s17   ;;  %s1627_s15 = smov %s1133_s16 }
 0x191   : > { %p11_p5 = scmp.ge.s32.totalorder %s14_s17, 4   ;;  %s1628_s16 = smov %s1630_s18 }
 0x193   :  { %13 = sbr.rel (!%p11_p5) target bundleno = 2 (0x2), region = 69 }

</bundles_post_ra>
